<compile_context>
chip_gen: v5e
topology: v5e:2x2
jax: 0.10.0
libtpu: 0.0.40
codegen_flags: <defaults>
</compile_context>

<pallas_src>
import jax
import jax.numpy as jnp
import numpy as np
from jax.experimental import pallas as pl
from jax.experimental.pallas import tpu as pltpu

_LANE = 128
_VMEM_LIMIT_BYTES = 32 * 1024 * 1024   # safe scoped-VMEM request on v5e/v6e/v7x
_FUSED_MAX_ELEMS = 512 * 1024          # <= 2 MiB f32 per array -> fused fast path
_TILE_TARGET_BYTES = 2 << 20           # ~2 MiB (f32-equivalent) streaming tiles


# --------------------------------------------------------------------------- #
# Kernels
# --------------------------------------------------------------------------- #
def _make_fused_kernel(inv_n, eps, pad_count):
    """Single-shot LayerNorm: stats + finalize + normalize/affine in one body."""
    inv_n = float(inv_n)
    eps = float(eps)
    pad_count = float(pad_count)

    def kernel(x_ref, w_ref, b_ref, o_ref):
        x = x_ref[...].astype(jnp.float32)
        mean = jnp.sum(x) * inv_n                    # true N (pad elems are 0)
        xc = x - mean
        # Exact centered variance; padded zeros each contribute mean^2 -> remove.
        ssq = jnp.sum(xc * xc) - pad_count * mean * mean
        var = jnp.maximum(ssq * inv_n, 0.0)
        inv_std = jax.lax.rsqrt(var + eps)
        w = w_ref[...].astype(jnp.float32)
        b = b_ref[...].astype(jnp.float32)
        o_ref[...] = (xc * inv_std * w + b).astype(o_ref.dtype)

    return kernel


def _make_stats_kernel(inv_n, eps):
    """Streaming pass 1: lane-parallel partial sums; finalize on last grid step."""
    inv_n = float(inv_n)
    eps = float(eps)

    def kernel(x_ref, mean_ref, istd_ref, sum_acc, sumsq_acc):
        @pl.when(pl.program_id(0) == 0)
        def _():
            sum_acc[...] = jnp.zeros_like(sum_acc)
            sumsq_acc[...] = jnp.zeros_like(sumsq_acc)

        x = x_ref[...].astype(jnp.float32)
        # (block_rows, 128) -> (block_rows//8, 8, 128); axis-0 sum is a sequence
        # of full-vreg VPU adds (no per-tile cross-lane XLU work), fully hidden
        # under the DMA.  Also improves f32 summation accuracy (lane partials).
        x3 = x.reshape(-1, 8, _LANE)
        sum_acc[...] += jnp.sum(x3, axis=0)
        sumsq_acc[...] += jnp.sum(x3 * x3, axis=0)

        @pl.when(pl.program_id(0) == pl.num_programs(0) - 1)
        def _():
            # Single cross-lane reduce + rsqrt, once, in-kernel (no XLA epilogue).
            mean = jnp.sum(sum_acc[...]) * inv_n
            var = jnp.maximum(jnp.sum(sumsq_acc[...]) * inv_n - mean * mean, 0.0)
            inv_std = jax.lax.rsqrt(var + eps)
            mean_ref[...] = jnp.full((1, _LANE), mean, jnp.float32)
            istd_ref[...] = jnp.full((1, _LANE), inv_std, jnp.float32)

    return kernel


def _norm_affine_kernel(mean_ref, istd_ref, x_ref, w_ref, b_ref, o_ref):
    """Streaming pass 2: out = (x - mean) * inv_std * w + b (pure VPU stream)."""
    x = x_ref[...].astype(jnp.float32)
    w = w_ref[...].astype(jnp.float32)
    b = b_ref[...].astype(jnp.float32)
    o_ref[...] = ((x - mean_ref[...]) * istd_ref[...] * w + b).astype(o_ref.dtype)


# --------------------------------------------------------------------------- #
# Layout helpers
# --------------------------------------------------------------------------- #
def _sublane_pack(dtype):
    """Sublane packing: 8 for 4-byte, 16 for 2-byte, 32 for 1-byte dtypes."""
    itemsize = jnp.dtype(dtype).itemsize
    return max(8, 32 // max(1, itemsize))


def _to_rows(a, padded_total):
    """Flatten, zero-pad to padded_total elements, view as (rows, 128)."""
    flat = a.reshape(-1)
    pad = padded_total - flat.shape[0]
    if pad:
        flat = jnp.pad(flat, (0, pad))
    return flat.reshape(-1, _LANE)


def _plan_streaming(total, sublane, block_rows_override=None):
    """Pick (padded_rows, block_rows, num_tiles) for the streaming path."""
    rows = -(-total // _LANE)
    if block_rows_override is not None:
        br = int(block_rows_override)
        br = max(sublane, -(-br // sublane) * sublane)
    else:
        br = max(sublane, (_TILE_TARGET_BYTES // (4 * _LANE) // sublane) * sublane)
        # Prefer an exact divisor of rows near the target (avoids any pad copy).
        if total % _LANE == 0:
            for cand in range(min(rows, br), sublane - 1, -1):
                if rows % cand == 0 and cand % sublane == 0:
                    return rows, cand, rows // cand
    br = min(br, -(-rows // sublane) * sublane)
    padded_rows = -(-rows // br) * br
    return padded_rows, br, padded_rows // br


# --------------------------------------------------------------------------- #
# Public wrapper (== LayerNorm.forward(input, idx); idx is unused upstream)
# --------------------------------------------------------------------------- #
def mtgnn_layer_norm(x, weight, bias, eps=1e-5, *, block_rows=None,
                     max_fused_elems=_FUSED_MAX_ELEMS):
    """F.layer_norm(x, x.shape, weight, bias, eps): stats over ALL elements.

    x, weight, bias share the same (full) shape.  Returns x's shape and dtype.
    `block_rows` forces the streaming two-pass path with the given tile rows.
    """
    orig_shape = x.shape
    total = int(np.prod(orig_shape)) if orig_shape else 1
    inv_n = 1.0 / total

    # -------- Fused fast path: whole problem resident in VMEM. --------
    if block_rows is None and total <= max_fused_elems:
        padded_total = -(-total // _LANE) * _LANE
        rows = padded_total // _LANE
        pad = padded_total - total
        x2 = _to_rows(x, padded_total)
        w2 = _to_rows(weight, padded_total)
        b2 = _to_rows(bias, padded_total)
        out2 = pl.pallas_call(
            _make_fused_kernel(inv_n, eps, pad),
            out_shape=jax.ShapeDtypeStruct((rows, _LANE), x.dtype),
            in_specs=[pl.BlockSpec(memory_space=pltpu.MemorySpace.VMEM)] * 3,
            out_specs=pl.BlockSpec(memory_space=pltpu.MemorySpace.VMEM),
            compiler_params=pltpu.CompilerParams(
                vmem_limit_bytes=_VMEM_LIMIT_BYTES),
        )(x2, w2, b2)
        out_flat = out2.reshape(-1)
        if pad:
            out_flat = out_flat[:total]
        return out_flat.reshape(orig_shape)

    # -------- Streaming two-pass path (large tensors). --------
    sublane = _sublane_pack(x.dtype)
    padded_rows, brows, num_tiles = _plan_streaming(total, sublane, block_rows)
    padded_total = padded_rows * _LANE
    pad = padded_total - total

    x2 = _to_rows(x, padded_total)
    w2 = _to_rows(weight, padded_total)
    b2 = _to_rows(bias, padded_total)

    # Pass 1: stream x only (1x tensor bytes); finalize mean/inv_std in-kernel.
    mean_arr, istd_arr = pl.pallas_call(
        _make_stats_kernel(inv_n, eps),
        out_shape=(jax.ShapeDtypeStruct((1, _LANE), jnp.float32),
                   jax.ShapeDtypeStruct((1, _LANE), jnp.float32)),
        grid=(num_tiles,),
        in_specs=[pl.BlockSpec((brows, _LANE), lambda i: (i, 0))],
        out_specs=(pl.BlockSpec((1, _LANE), lambda i: (0, 0)),
                   pl.BlockSpec((1, _LANE), lambda i: (0, 0))),
        scratch_shapes=[pltpu.VMEM((8, _LANE), jnp.float32),
                        pltpu.VMEM((8, _LANE), jnp.float32)],
        compiler_params=pltpu.CompilerParams(
            dimension_semantics=("arbitrary",),        # resident accumulator
            vmem_limit_bytes=_VMEM_LIMIT_BYTES),
    )(x2)

    # Pass 2: fused normalize + affine; independent tiles ("parallel" -> v7x
    # can split across TensorCores).
    out2 = pl.pallas_call(
        _norm_affine_kernel,
        out_shape=jax.ShapeDtypeStruct((padded_rows, _LANE), x.dtype),
        grid=(num_tiles,),
        in_specs=[pl.BlockSpec((1, _LANE), lambda i: (0, 0)),
                  pl.BlockSpec((1, _LANE), lambda i: (0, 0)),
                  pl.BlockSpec((brows, _LANE), lambda i: (i, 0)),
                  pl.BlockSpec((brows, _LANE), lambda i: (i, 0)),
                  pl.BlockSpec((brows, _LANE), lambda i: (i, 0))],
        out_specs=pl.BlockSpec((brows, _LANE), lambda i: (i, 0)),
        compiler_params=pltpu.CompilerParams(
            dimension_semantics=("parallel",),
            vmem_limit_bytes=_VMEM_LIMIT_BYTES),
    )(mean_arr, istd_arr, x2, w2, b2)

    out_flat = out2.reshape(-1)
    if pad:
        out_flat = out_flat[:total]
    return out_flat.reshape(orig_shape)


# --------------------------------------------------------------------------- #
# Reference + self-test
# --------------------------------------------------------------------------- #
def _reference(x, w, b, eps):
    """Pure-JAX F.layer_norm over the full tensor shape + elementwise affine."""
    xf = x.astype(jnp.float32)
    mean = jnp.mean(xf)
    var = jnp.mean((xf - mean) ** 2)
    return ((xf - mean) * jax.lax.rsqrt(var + eps) * w + b).astype(x.dtype)


if __name__ == "__main__":
    eps = 1e-5
    key = jax.random.PRNGKey(0)
    k1, k2, k3, k4 = jax.random.split(key, 4)

    # Primary test: small NCHW activations as produced by the MTGNN conv stack:
    # (batch=2, channels=4, num_nodes=32, seq_len=64).  Hits the fused path.
    B, C, H, W = 2, 4, 32, 64
    shape = (B, C, H, W)
    x = jax.random.normal(k1, shape, dtype=jnp.float32)
    # Module init is ones/zeros (reset_parameters); perturb slightly so the
    # affine path is actually exercised.
    weight = jnp.ones(shape, jnp.float32) + 0.1 * jax.random.normal(k2, shape, jnp.float32)
    bias = 0.1 * jax.random.normal(k3, shape, jnp.float32)
    # TODO(synk): `idx` is accepted by the PyTorch forward but never used there;
    # it is therefore not an argument of the Pallas wrapper.

    ref = _reference(x, weight, bias, eps)
    out = jax.block_until_ready(mtgnn_layer_norm(x, weight, bias, eps=eps))
    np.testing.assert_allclose(np.asarray(out), np.asarray(ref), rtol=1e-4, atol=1e-4)

    # Forced streaming two-pass path (multi-tile): exercises the pl.when-init
    # accumulator, the in-kernel finalize, and the parallel normalize pass.
    out_s = jax.block_until_ready(
        mtgnn_layer_norm(x, weight, bias, eps=eps, block_rows=16))
    np.testing.assert_allclose(np.asarray(out_s), np.asarray(ref), rtol=1e-4, atol=1e-4)

    # Odd element count (not a multiple of 128): lane-dense zero-pad path with
    # exact analytic pad correction (fused) ...
    shape2 = (3, 5, 7, 11)
    x_odd = jax.random.normal(k4, shape2, dtype=jnp.float32)
    w_odd = jnp.ones(shape2, jnp.float32)
    b_odd = jnp.zeros(shape2, jnp.float32)
    ref_odd = _reference(x_odd, w_odd, b_odd, eps)
    out_odd = jax.block_until_ready(mtgnn_layer_norm(x_odd, w_odd, b_odd, eps=eps))
    np.testing.assert_allclose(np.asarray(out_odd), np.asarray(ref_odd), rtol=1e-4, atol=1e-4)

    # ... and the padded streaming path (zeros contribute nothing to the sums).
    out_odd_s = jax.block_until_ready(
        mtgnn_layer_norm(x_odd, w_odd, b_odd, eps=eps, block_rows=8))
    np.testing.assert_allclose(np.asarray(out_odd_s), np.asarray(ref_odd), rtol=1e-4, atol=1e-4)

    print("KERNEL_OK")
</pallas_src>

<mosaic_0001>
module attributes {stable_mosaic.version = 11 : i64} {
  func.func @kernel(%arg0: memref<128x128xf32, #tpu.memory_space<vmem>>, %arg1: memref<128x128xf32, #tpu.memory_space<vmem>>, %arg2: memref<128x128xf32, #tpu.memory_space<vmem>>, %arg3: memref<128x128xf32, #tpu.memory_space<vmem>>) attributes {dimension_semantics = [], scalar_prefetch = 0 : i64, scratch_operands = 0 : i64, tpu.core_type = #tpu.core_type<tc>} {
    %c0 = arith.constant 0 : index
    %c0_0 = arith.constant 0 : index
    %0 = vector.load %arg0[%c0, %c0_0] : memref<128x128xf32, #tpu.memory_space<vmem>>, vector<128x128xf32>
    %1 = vector.shape_cast %0 : vector<128x128xf32> to vector<1x128x128xf32>
    %cst = arith.constant dense<0.000000e+00> : vector<1xf32>
    %2 = vector.multi_reduction <add>, %1, %cst [1, 2] : vector<1x128x128xf32> to vector<1xf32>
    %3 = vector.shape_cast %2 : vector<1xf32> to vector<1x1x1xf32>
    %4 = vector.extract %3[0, 0, 0] : f32 from vector<1x1x1xf32>
    %cst_1 = arith.constant 6.10351563E-5 : f32
    %5 = arith.mulf %4, %cst_1 : f32
    %6 = vector.broadcast %5 : f32 to vector<128x128xf32>
    %7 = arith.subf %0, %6 : vector<128x128xf32>
    %8 = arith.mulf %7, %7 : vector<128x128xf32>
    %9 = vector.shape_cast %8 : vector<128x128xf32> to vector<1x128x128xf32>
    %cst_2 = arith.constant dense<0.000000e+00> : vector<1xf32>
    %10 = vector.multi_reduction <add>, %9, %cst_2 [1, 2] : vector<1x128x128xf32> to vector<1xf32>
    %11 = vector.shape_cast %10 : vector<1xf32> to vector<1x1x1xf32>
    %12 = vector.extract %11[0, 0, 0] : f32 from vector<1x1x1xf32>
    %cst_3 = arith.constant 0.000000e+00 : f32
    %13 = arith.mulf %cst_3, %5 : f32
    %14 = arith.mulf %13, %5 : f32
    %15 = arith.subf %12, %14 : f32
    %cst_4 = arith.constant 6.10351563E-5 : f32
    %16 = arith.mulf %15, %cst_4 : f32
    %cst_5 = arith.constant 0.000000e+00 : f32
    %17 = arith.maximumf %16, %cst_5 : f32
    %cst_6 = arith.constant 9.99999974E-6 : f32
    %18 = arith.addf %17, %cst_6 : f32
    %19 = math.rsqrt %18 : f32
    %c0_7 = arith.constant 0 : index
    %c0_8 = arith.constant 0 : index
    %20 = vector.load %arg1[%c0_7, %c0_8] : memref<128x128xf32, #tpu.memory_space<vmem>>, vector<128x128xf32>
    %c0_9 = arith.constant 0 : index
    %c0_10 = arith.constant 0 : index
    %21 = vector.load %arg2[%c0_9, %c0_10] : memref<128x128xf32, #tpu.memory_space<vmem>>, vector<128x128xf32>
    %22 = vector.broadcast %19 : f32 to vector<128x128xf32>
    %23 = arith.mulf %7, %22 : vector<128x128xf32>
    %24 = arith.mulf %23, %20 : vector<128x128xf32>
    %25 = arith.addf %24, %21 : vector<128x128xf32>
    %c0_11 = arith.constant 0 : index
    %c0_12 = arith.constant 0 : index
    %26 = vector.load %arg3[%c0_11, %c0_12] : memref<128x128xf32, #tpu.memory_space<vmem>>, vector<128x128xf32>
    tpu.vector_store %arg3[%c0_11, %c0_12], %25 {strides = array<i32>} : memref<128x128xf32, #tpu.memory_space<vmem>>, vector<128x128xf32>,
    return
  }
}

</mosaic_0001>

<bundles_post_ra>
// kernel: tpu_custom_call.1
= control target key start
LH: loop header
LB: loop body
LE: loop exit
PB: predicated region body
PF: predicated region fallthrough
CT: control target
= control target key end

     0   :  { %8 = vsyncpa [#allocation3], 0  ;;  %s566_s0 = inlined_call_operand.hbm [shape: f32[128,128], index: 0, kind: input, shape index: {}]   ;;  %s567_s1 = inlined_call_operand.hbm [shape: f32[128,128], index: 1, kind: input, shape index: {}]   ;;  %s568_s2 = inlined_call_operand.hbm [shape: f32[128,128], index: 2, kind: input, shape index: {}]   ;;  %s569_s3 = inlined_call_operand.hbm [shape: f32[128,128], index: 3, kind: output, shape index: {}]  }
   0x1   :  { %9 = vsyncpa [#allocation6], 0 }
   0x2   :  { %10 = vsyncpa [#allocation4], 0  ;;  %s28_s14 = sshll.u32 %s567_s1, 4  ;;  %s412_s15 = smov [#allocation5]   ;;  %s29_s14 = int_to_ptr.hbm [resolvable:$true] %s28_s14 }
   0x3   :  { %s30_s16 = sshll.u32 %s412_s15, 4  ;;  %s15_s19 = sshll.u32 %s566_s0, 4  ;;  %s31_s16 = int_to_ptr.vmem [resolvable:$true] %s30_s16  ;;  %s16_s19 = int_to_ptr.hbm [resolvable:$true] %s15_s19 }
   0x4   :  { %s413_s20 = smov 128   ;;  %s414_s21 = smov 8  }
   0x5   :  { %36 = dma.hbm_to_vmem [thread:$0]  %s29_s14, 2048, %s31_s16, [#allocation6], %s413_s20, %s413_s20, %s414_s21  }
   0x6   :  { %s415_s22 = smov [#allocation2]   ;;  %s41_s1 = sshll.u32 %s568_s2, 4  ;;  %s42_s1 = int_to_ptr.hbm [resolvable:$true] %s41_s1 }
   0x7   :  { %s17_s23 = sshll.u32 %s415_s22, 4  ;;  %s416_s0 = smov [#allocation7]   ;;  %s18_s23 = int_to_ptr.vmem [resolvable:$true] %s17_s23 }
   0x8   :  { %23 = dma.hbm_to_vmem [thread:$0]  %s16_s19, 2048, %s18_s23, [#allocation3], %s413_s20, %s413_s20, %s414_s21  }
   0x9   :  { %s43_s26 = sshll.u32 %s416_s0, 4  ;;  %s44_s26 = int_to_ptr.vmem [resolvable:$true] %s43_s26 }
   0xa   :  { %49 = dma.hbm_to_vmem [thread:$0]  %s42_s1, 2048, %s44_s26, [#allocation6], %s413_s20, %s413_s20, %s414_s21  }
   0xb   :  { %406 = dma.done.wait [#allocation3], 2048  }
   0xc   :  { %407 = vsyncadd [#allocation3], 4294965248 }
   0xd   :  { %408 = dma.done.wait [#allocation6], 4096  }
   0xe   :  { %409 = vsyncadd [#allocation6], 4294963200  ;;  %v62_v0 = vld [vmem:[#allocation2] sm:$0xff]  ;;  %v63_v1 = vld [vmem:[#allocation2 + $0x8] sm:$0xff]  ;;  %s417_s6 = smov 0.0   ;;  %s418_s10 = smov [#allocation8]  }
   0xf   :  { %v64_v2 = vld [vmem:[#allocation2 + $0x10] sm:$0xff]  ;;  %v78_v3 = vadd.f32 %v63_v1, %v62_v0  ;;  %v65_v4 = vld [vmem:[#allocation2 + $0x18] sm:$0xff]  ;;  %v66_v6 = vld [vmem:[#allocation2 + $0x20] sm:$0xff]  ;;  %s279_s11 = sshll.u32 %s418_s10, 4  ;;  %s281_s14 = sshll.u32 %s569_s3, 4  ;;  %s280_s11 = int_to_ptr.vmem [resolvable:$true] %s279_s11  ;;  %s282_s14 = int_to_ptr.hbm [resolvable:$true] %s281_s14 }
  0x10   :  { %v67_v8 = vld [vmem:[#allocation2 + $0x28] sm:$0xff]  ;;  %v68_v10 = vld [vmem:[#allocation2 + $0x30] sm:$0xff]  ;;  %v69_v12 = vld [vmem:[#allocation2 + $0x38] sm:$0xff] }
  0x11   :  { %v79_v5 = vadd.f32 %v78_v3, %v64_v2  ;;  %v70_v14 = vld [vmem:[#allocation2 + $0x40] sm:$0xff]  ;;  %v71_v16 = vld [vmem:[#allocation2 + $0x48] sm:$0xff]  ;;  %v72_v18 = vld [vmem:[#allocation2 + $0x50] sm:$0xff] }
  0x12   :  { %v73_v20 = vld [vmem:[#allocation2 + $0x58] sm:$0xff]  ;;  %v74_v22 = vld [vmem:[#allocation2 + $0x60] sm:$0xff]  ;;  %v75_v24 = vld [vmem:[#allocation2 + $0x68] sm:$0xff] }
  0x13   :  { %v80_v7 = vadd.f32 %v79_v5, %v65_v4  ;;  %v76_v26 = vld [vmem:[#allocation2 + $0x70] sm:$0xff]  ;;  %v77_v28 = vld [vmem:[#allocation2 + $0x78] sm:$0xff] }
  0x15   :  { %v81_v9 = vadd.f32 %v80_v7, %v66_v6 }
  0x17   :  { %v82_v11 = vadd.f32 %v81_v9, %v67_v8 }
  0x19   :  { %v83_v13 = vadd.f32 %v82_v11, %v68_v10 }
  0x1b   :  { %v84_v15 = vadd.f32 %v83_v13, %v69_v12 }
  0x1d   :  { %v85_v17 = vadd.f32 %v84_v15, %v70_v14 }
  0x1f   :  { %v86_v19 = vadd.f32 %v85_v17, %v71_v16 }
  0x21   :  { %v87_v21 = vadd.f32 %v86_v19, %v72_v18 }
  0x23   :  { %v88_v23 = vadd.f32 %v87_v21, %v73_v20 }
  0x25   :  { %v89_v25 = vadd.f32 %v88_v23, %v74_v22 }
  0x27   :  { %v90_v27 = vadd.f32 %v89_v25, %v75_v24 }
  0x29   :  { %v91_v29 = vadd.f32 %v90_v27, %v76_v26 }
  0x2b   :  { %v92_v30 = vadd.f32 %v91_v29, %v77_v28 }
  0x2d   :  { %93 = vadd.xlane.f32.xlu0 %v92_v30 }
  0xa0   :  { %v94_v31 = vpop.xlane.xlu0 %93 }
  0xa1   :  { %v95_v32 = vrot.slane %v94_v31, 4 }
  0xa3   :  { %v96_v33 = vadd.f32 %v95_v32, %v94_v31 }
  0xa5   :  { %v97_v34 = vrot.slane %v96_v33, 2 }
  0xa7   :  { %v98_v35 = vadd.f32 %v97_v34, %v96_v33 }
  0xa9   :  { %v99_v36 = vrot.slane %v98_v35, 1 }
  0xab   :  { %v100_v37 = vadd.f32 %v99_v36, %v98_v35 }
  0xad   :  { %295 = vpush %v100_v37 }
  0xde   :  { %s296_s2 = spop %295 }
  0xdf   :  { %s457_s27 = smul.f32 6.1035156e-05, %s296_s2 }
  0xe1   :  { %v103_v38 = vstv %s457_s27  ;;  %s160_s28 = smul.f32 0.0, %s457_s27 }
  0xe2   :  { %v460_v39 = vsub.f32 %v62_v0, %v103_v38  ;;  %v462_v40 = vsub.f32 %v63_v1, %v103_v38  ;;  %v464_v41 = vsub.f32 %v64_v2, %v103_v38  ;;  %v470_v44 = vsub.f32 %v65_v4, %v103_v38 }
  0xe3   :  { %v472_v45 = vsub.f32 %v66_v6, %v103_v38  ;;  %v476_v48 = vsub.f32 %v67_v8, %v103_v38  ;;  %v480_v51 = vsub.f32 %v68_v10, %v103_v38  ;;  %v484_v54 = vsub.f32 %v69_v12, %v103_v38  ;;  %s161_s29 = smul.f32 %s160_s28, %s457_s27 }
  0xe4   :  { %v120_v42 = vmul.f32 %v460_v39, %v460_v39  ;;  %v121_v43 = vmul.f32 %v462_v40, %v462_v40  ;;  %v122_v46 = vmul.f32 %v464_v41, %v464_v41  ;;  %v123_v49 = vmul.f32 %v470_v44, %v470_v44 }
  0xe5   :  { %v124_v52 = vmul.f32 %v472_v45, %v472_v45  ;;  %v125_v55 = vmul.f32 %v476_v48, %v476_v48  ;;  %v488_v57 = vsub.f32 %v70_v14, %v103_v38  ;;  %v126_v58 = vmul.f32 %v480_v51, %v480_v51 }
  0xe6   :  { %v136_v47 = vadd.f32 %v121_v43, %v120_v42  ;;  %v492_v60 = vsub.f32 %v71_v16, %v103_v38  ;;  %v127_v61 = vmul.f32 %v484_v54, %v484_v54  ;;  %v496_v63 = vsub.f32 %v72_v18, %v103_v38 }
  0xe7   :  { %v128_v0 = vmul.f32 %v488_v57, %v488_v57  ;;  %v500_v2 = vsub.f32 %v73_v20, %v103_v38  ;;  %v504_v5 = vsub.f32 %v74_v22, %v103_v38  ;;  %v508_v8 = vsub.f32 %v75_v24, %v103_v38 }
  0xe8   :  { %v137_v50 = vadd.f32 %v136_v47, %v122_v46  ;;  %v129_v3 = vmul.f32 %v492_v60, %v492_v60  ;;  %v130_v6 = vmul.f32 %v496_v63, %v496_v63  ;;  %v512_v11 = vsub.f32 %v76_v26, %v103_v38  ;;  %v178_v46 = vld [vmem:[#allocation5] sm:$0xff]  ;;  %v179_v47 = vld [vmem:[#allocation5 + $0x8] sm:$0xff] }
  0xe9   :  { %v131_v9 = vmul.f32 %v500_v2, %v500_v2  ;;  %v132_v12 = vmul.f32 %v504_v5, %v504_v5  ;;  %v516_v14 = vsub.f32 %v77_v28, %v103_v38  ;;  %v133_v15 = vmul.f32 %v508_v8, %v508_v8 }
  0xea   :  { %v138_v53 = vadd.f32 %v137_v50, %v123_v49  ;;  %v134_v17 = vmul.f32 %v512_v11, %v512_v11  ;;  %v180_v49 = vld [vmem:[#allocation5 + $0x10] sm:$0xff] }
  0xeb   :  { %v135_v19 = vmul.f32 %v516_v14, %v516_v14 }
  0xec   :  { %v139_v56 = vadd.f32 %v138_v53, %v124_v52  ;;  %v181_v52 = vld [vmem:[#allocation5 + $0x18] sm:$0xff] }
  0xee   :  { %v140_v59 = vadd.f32 %v139_v56, %v125_v55  ;;  %v182_v55 = vld [vmem:[#allocation5 + $0x20] sm:$0xff]  ;;  %v183_v56 = vld [vmem:[#allocation5 + $0x28] sm:$0xff] }
  0xf0   :  { %v141_v62 = vadd.f32 %v140_v59, %v126_v58  ;;  %v184_v58 = vld [vmem:[#allocation5 + $0x30] sm:$0xff] }
  0xf2   :  { %v142_v1 = vadd.f32 %v141_v62, %v127_v61  ;;  %v194_v62 = vld [vmem:[#allocation7] sm:$0xff] }
  0xf4   :  { %v143_v4 = vadd.f32 %v142_v1, %v128_v0  ;;  %v195_v0 = vld [vmem:[#allocation7 + $0x8] sm:$0xff]  ;;  %v196_v1 = vld [vmem:[#allocation7 + $0x10] sm:$0xff] }
  0xf6   :  { %v144_v7 = vadd.f32 %v143_v4, %v129_v3  ;;  %v197_v4 = vld [vmem:[#allocation7 + $0x18] sm:$0xff] }
  0xf8   :  { %v145_v10 = vadd.f32 %v144_v7, %v130_v6  ;;  %v186_v7 = vld [vmem:[#allocation5 + $0x40] sm:$0xff] }
  0xfa   :  { %v146_v13 = vadd.f32 %v145_v10, %v131_v9  ;;  %v198_v9 = vld [vmem:[#allocation7 + $0x20] sm:$0xff] }
  0xfc   :  { %v147_v16 = vadd.f32 %v146_v13, %v132_v12  ;;  %v187_v13 = vld [vmem:[#allocation5 + $0x48] sm:$0xff] }
  0xfe   :  { %v148_v18 = vadd.f32 %v147_v16, %v133_v15  ;;  %v199_v15 = vld [vmem:[#allocation7 + $0x28] sm:$0xff] }
 0x100   :  { %v149_v20 = vadd.f32 %v148_v18, %v134_v17 }
 0x102   :  { %v150_v21 = vadd.f32 %v149_v20, %v135_v19  ;;  %v188_v19 = vld [vmem:[#allocation5 + $0x50] sm:$0xff] }
 0x103   :  { %v200_v20 = vld [vmem:[#allocation7 + $0x30] sm:$0xff] }
 0x104   :  { %151 = vadd.xlane.f32.xlu0 %v150_v21 }
 0x177   :  { %v152_v22 = vpop.xlane.xlu0 %151 }
 0x178   :  { %v153_v23 = vrot.slane %v152_v22, 4 }
 0x17a   :  { %v154_v24 = vadd.f32 %v153_v23, %v152_v22  ;;  %v189_v23 = vld [vmem:[#allocation5 + $0x58] sm:$0xff] }
 0x17c   :  { %v155_v25 = vrot.slane %v154_v24, 2 }
 0x17e   :  { %v156_v26 = vadd.f32 %v155_v25, %v154_v24  ;;  %v201_v24 = vld [vmem:[#allocation7 + $0x38] sm:$0xff] }
 0x180   :  { %v157_v27 = vrot.slane %v156_v26, 1 }
 0x182   :  { %v158_v28 = vadd.f32 %v157_v27, %v156_v26  ;;  %v190_v26 = vld [vmem:[#allocation5 + $0x60] sm:$0xff] }
 0x183   :  { %v202_v27 = vld [vmem:[#allocation7 + $0x40] sm:$0xff] }
 0x184   :  { %297 = vpush %v158_v28 }
 0x1b5   :  { %s298_s30 = spop %297 }
 0x1b6   :  { %s162_s4 = ssub.f32 %s298_s30, %s161_s29 }
 0x1b8   :  { %s163_s5 = smul.f32 6.1035156e-05, %s162_s4 }
 0x1ba   :  { %s164_s7 = smax.f32 %s417_s6, %s163_s5 }
 0x1bb   :  { %s165_s8 = sadd.f32 1e-05, %s164_s7 }
 0x1bd   :  { %v166_v29 = vstv %s165_s8 }
 0x1be   :  { %308 = vrsqrt.f32 %v166_v29  ;;  %vm173_vm1 = vweird.f32 %v166_v29 }
 0x1c4   :  { %v309_v30 = vpop.eup %308 }
 0x1c5   :  { %v168_v31 = vmul.f32 %v309_v30, %v166_v29  ;;  %vm174_vm0 = vweird.f32 %v309_v30 }
 0x1c6   :  { %vm175_vm2 = vmor %vm173_vm1, %vm174_vm0 }
 0x1c7   :  { %v169_v32 = vmul.f32 %v309_v30, %v168_v31  ;;  %v191_v31 = vld [vmem:[#allocation5 + $0x68] sm:$0xff] }
 0x1c9   :  { %v170_v33 = vmul.f32 0.5, %v169_v32 }
 0x1cb   :  { %v171_v34 = vsub.f32 1.5, %v170_v33 }
 0x1cd   :  { %v172_v35 = vmul.f32 %v309_v30, %v171_v34 }
 0x1cf   :  { %v176_v36 = vsel %vm175_vm2, %v309_v30, %v172_v35  ;;  %v204_v35 = vld [vmem:[#allocation7 + $0x50] sm:$0xff] }
 0x1d0   :  { %299 = vpush %v176_v36 }
 0x201   :  { %s300_s9 = spop %299 }
 0x202   :  { %v526_v37 = vstv %s300_s9 }
 0x203   :  { %v211_v38 = vmul.f32 %v526_v37, %v460_v39  ;;  %v212_v42 = vmul.f32 %v526_v37, %v462_v40  ;;  %v213_v43 = vmul.f32 %v526_v37, %v464_v41  ;;  %v214_v50 = vmul.f32 %v526_v37, %v470_v44 }
 0x204   :  { %v215_v53 = vmul.f32 %v526_v37, %v472_v45  ;;  %v216_v39 = vmul.f32 %v526_v37, %v476_v48  ;;  %v217_v40 = vmul.f32 %v526_v37, %v480_v51  ;;  %v218_v44 = vmul.f32 %v526_v37, %v484_v54  ;;  %v185_v45 = vld [vmem:[#allocation5 + $0x38] sm:$0xff] }
 0x205   :  { %v227_v41 = vmul.f32 %v211_v38, %v178_v46  ;;  %v228_v59 = vmul.f32 %v212_v42, %v179_v47  ;;  %v229_v61 = vmul.f32 %v213_v43, %v180_v49  ;;  %v230_v3 = vmul.f32 %v214_v50, %v181_v52  ;;  %v205_v43 = vld [vmem:[#allocation7 + $0x58] sm:$0xff]  ;;  %v206_v49 = vld [vmem:[#allocation7 + $0x60] sm:$0xff] }
 0x206   :  { %v219_v48 = vmul.f32 %v526_v37, %v488_v57  ;;  %v231_v6 = vmul.f32 %v215_v53, %v182_v55  ;;  %v220_v51 = vmul.f32 %v526_v37, %v492_v60  ;;  %v221_v10 = vmul.f32 %v526_v37, %v496_v63 }
 0x207   :  { %v232_v12 = vmul.f32 %v216_v39, %v183_v56  ;;  %v233_v16 = vmul.f32 %v217_v40, %v184_v58  ;;  %v243_v54 = vadd.f32 %v227_v41, %v194_v62  ;;  %v244_v17 = vadd.f32 %v228_v59, %v195_v0  ;;  %v208_v39 = vld [vmem:[#allocation7 + $0x70] sm:$0xff] }
 0x208   :  { %v245_v18 = vadd.f32 %v229_v61, %v196_v1  ;;  %v222_v57 = vmul.f32 %v526_v37, %v500_v2  ;;  %v234_v21 = vmul.f32 %v218_v44, %v185_v45  ;;  %v246_v22 = vadd.f32 %v230_v3, %v197_v4  ;;  %v203_v2 = vld [vmem:[#allocation7 + $0x48] sm:$0xff] }
 0x209   :  { %v223_v60 = vmul.f32 %v526_v37, %v504_v5  ;;  %v235_v63 = vmul.f32 %v219_v48, %v186_v7  ;;  %v247_v25 = vadd.f32 %v231_v6, %v198_v9  ;;  %259 = vst [vmem:[#allocation8] sm:$0xff] %v243_v54  ;;  %v224_v28 = vmul.f32 %v526_v37, %v508_v8  ;;  %v192_v5 = vld [vmem:[#allocation5 + $0x70] sm:$0xff]  ;;  %v193_v8 = vld [vmem:[#allocation5 + $0x78] sm:$0xff] }
 0x20a   :  { %v236_v29 = vmul.f32 %v220_v51, %v187_v13  ;;  %v248_v30 = vadd.f32 %v232_v12, %v199_v15  ;;  %260 = vst [vmem:[#allocation8 + $0x8] sm:$0xff] %v244_v17  ;;  %v225_v32 = vmul.f32 %v526_v37, %v512_v11  ;;  %v237_v33 = vmul.f32 %v221_v10, %v188_v19  ;;  %v207_v11 = vld [vmem:[#allocation7 + $0x68] sm:$0xff] }
 0x20b   :  { %v249_v34 = vadd.f32 %v233_v16, %v200_v20  ;;  %261 = vst [vmem:[#allocation8 + $0x10] sm:$0xff] %v245_v18  ;;  %v226_v36 = vmul.f32 %v526_v37, %v516_v14  ;;  %v238_v38 = vmul.f32 %v222_v57, %v189_v23  ;;  %v250_v42 = vadd.f32 %v234_v21, %v201_v24  ;;  %v209_v14 = vld [vmem:[#allocation7 + $0x78] sm:$0xff] }
 0x20c   :  { %262 = vst [vmem:[#allocation8 + $0x18] sm:$0xff] %v246_v22  ;;  %v239_v46 = vmul.f32 %v223_v60, %v190_v26  ;;  %v251_v47 = vadd.f32 %v235_v63, %v202_v27  ;;  %v240_v50 = vmul.f32 %v224_v28, %v191_v31  ;;  %v252_v52 = vadd.f32 %v236_v29, %v203_v2 }
 0x20d   :  { %263 = vst [vmem:[#allocation8 + $0x20] sm:$0xff] %v247_v25  ;;  %v241_v53 = vmul.f32 %v225_v32, %v192_v5  ;;  %v253_v55 = vadd.f32 %v237_v33, %v204_v35  ;;  %v242_v56 = vmul.f32 %v226_v36, %v193_v8  ;;  %v254_v58 = vadd.f32 %v238_v38, %v205_v43 }
 0x20e   :  { %264 = vst [vmem:[#allocation8 + $0x28] sm:$0xff] %v248_v30  ;;  %v255_v37 = vadd.f32 %v239_v46, %v206_v49  ;;  %v256_v40 = vadd.f32 %v240_v50, %v207_v11 }
 0x20f   :  { %265 = vst [vmem:[#allocation8 + $0x30] sm:$0xff] %v249_v34  ;;  %v257_v41 = vadd.f32 %v241_v53, %v208_v39  ;;  %v258_v59 = vadd.f32 %v242_v56, %v209_v14 }
 0x210   :  { %266 = vst [vmem:[#allocation8 + $0x38] sm:$0xff] %v250_v42 }
 0x211   :  { %267 = vst [vmem:[#allocation8 + $0x40] sm:$0xff] %v251_v47 }
 0x212   :  { %268 = vst [vmem:[#allocation8 + $0x48] sm:$0xff] %v252_v52 }
 0x213   :  { %269 = vst [vmem:[#allocation8 + $0x50] sm:$0xff] %v253_v55 }
 0x214   :  { %270 = vst [vmem:[#allocation8 + $0x58] sm:$0xff] %v254_v58 }
 0x215   :  { %271 = vst [vmem:[#allocation8 + $0x60] sm:$0xff] %v255_v37 }
 0x216   :  { %272 = vst [vmem:[#allocation8 + $0x68] sm:$0xff] %v256_v40 }
 0x217   :  { %273 = vst [vmem:[#allocation8 + $0x70] sm:$0xff] %v257_v41 }
 0x218   :  { %274 = vst [vmem:[#allocation8 + $0x78] sm:$0xff] %v258_v59 }
 0x219   :  { %287 = dma.vmem_to_hbm [thread:$0]  %s280_s11, 2048, %s282_s14, [#allocation4], %s413_s20, %s413_s20, %s414_s21  }
 0x21a   :  { %410 = dma.done.wait [#allocation4], 2048  }
 0x21b   :  { %411 = vsyncadd [#allocation4], 4294965248 }
 0x21c   :  { %292 = vsyncpa [#allocation3], 1 }
 0x21d   :  { %293 = vsyncpa [#allocation6], 1 }
 0x21e   :  { %294 = vsyncpa [#allocation4], 1 }

</bundles_post_ra>
